<compile_context>
chip_gen: v7x
topology: tpu7x:2x2x1
jax: 0.10.0
libtpu: 0.0.40
codegen_flags: <defaults>
</compile_context>

<pallas_src>
import functools

import jax
import jax.numpy as jnp
from jax.experimental import pallas as pl
from jax.experimental.pallas import tpu as pltpu

_LANE = 128
_SUB = 16                       # row granularity (also valid bf16 (16,128) packing)
_MIN_ELEMS = _SUB * _LANE       # 2048: minimum padded length for tiny batches
_TILE_ROWS_MAX = 4096           # 4096*128*4B = 2 MiB f32 per operand tile
_SMALL_B_PALLAS = 4096          # below this, pure jnp beats a kernel launch


def _round_up(x, m):
    return ((x + m - 1) // m) * m


def _mrl_partial_sums_kernel(c_ref, o_ref, l_ref, acc_ref, *, n_valid,
                             tile_rows, tiles_per_core):
    """Accumulate centered partial sums for one (tile_rows, 128) tile.

    c_ref:   SMEM (1,) f32 centering constant.
    o_ref:   (tile_rows, 128) outputs tile (native dtype).
    l_ref:   (tile_rows, 128) labels tile (native dtype).
    acc_ref: (32, 128) f32 output block, resident across the inner grid axis:
             rows  0: 8 -> sum(o-c)      per (sublane, lane)
             rows  8:16 -> sum((o-c)^2)
             rows 16:24 -> sum(l-c)
             rows 24:32 -> sum((l-c)^2)
    """
    core = pl.program_id(0)
    t = pl.program_id(1)

    @pl.when(t == 0)
    def _init():
        acc_ref[...] = jnp.zeros_like(acc_ref)

    c = c_ref[0]
    o = o_ref[...].astype(jnp.float32) - c
    l = l_ref[...].astype(jnp.float32) - c

    # Mask everything beyond the true batch: lane padding, partial last blocks
    # (unspecified rows) and clamped "phantom" blocks of the core split.
    row0 = (core * tiles_per_core + t) * tile_rows
    rows = jax.lax.broadcasted_iota(jnp.int32, o.shape, 0)
    lanes = jax.lax.broadcasted_iota(jnp.int32, o.shape, 1)
    idx = (row0 + rows) * _LANE + lanes
    valid = idx < n_valid
    zero = jnp.zeros_like(o)
    o = jnp.where(valid, o, zero)
    l = jnp.where(valid, l, zero)

    def fold(x):  # (tile_rows, 128) -> (8, 128) with VPU adds only
        return jnp.sum(x.reshape(-1, 8, _LANE), axis=0)

    acc_ref[0:8, :] += fold(o)
    acc_ref[8:16, :] += fold(o * o)
    acc_ref[16:24, :] += fold(l)
    acc_ref[24:32, :] += fold(l * l)


def _mrl_loss_pallas(outputs, labels):
    B = outputs.shape[0]
    o = outputs.reshape(-1)
    l = labels.reshape(-1)
    c = l[:1].astype(jnp.float32)          # centering constant (≈ common mean)

    # Reshape to (R, 128). This is a free bitcast when B is already a multiple
    # of 128; only then-unaligned / tiny batches pay a pad copy.
    if B < _MIN_ELEMS:
        bp = _MIN_ELEMS
    else:
        bp = _round_up(B, _LANE)
    pad = bp - B
    if pad:
        o = jnp.pad(o, (0, pad))
        l = jnp.pad(l, (0, pad))
    rows_total = bp // _LANE
    o2 = o.reshape(rows_total, _LANE)
    l2 = l.reshape(rows_total, _LANE)

    tile_rows = min(_TILE_ROWS_MAX, (rows_total // _SUB) * _SUB)
    total_tiles = pl.cdiv(rows_total, tile_rows)
    num_cores = 2 if total_tiles >= 2 else 1        # v7x: use both TCs
    tiles_per_core = pl.cdiv(total_tiles, num_cores)

    def data_idx(core, t, tpc=tiles_per_core, last=total_tiles - 1):
        # Clamp so phantom blocks of an uneven core split never DMA past the
        # array; their contribution is masked in-kernel anyway.
        return (jnp.minimum(core * tpc + t, last), 0)

    kernel = functools.partial(
        _mrl_partial_sums_kernel,
        n_valid=B, tile_rows=tile_rows, tiles_per_core=tiles_per_core)

    out_rows = num_cores * 32
    bytes_accessed = (o2.size * o2.dtype.itemsize
                      + l2.size * l2.dtype.itemsize
                      + out_rows * _LANE * 4 + 4)

    partials = pl.pallas_call(
        kernel,
        out_shape=jax.ShapeDtypeStruct((out_rows, _LANE), jnp.float32),
        grid_spec=pltpu.PrefetchScalarGridSpec(
            num_scalar_prefetch=0,
            grid=(num_cores, tiles_per_core),
            in_specs=[
                pl.BlockSpec(memory_space=pltpu.MemorySpace.SMEM),   # c
                pl.BlockSpec((tile_rows, _LANE), data_idx),          # outputs
                pl.BlockSpec((tile_rows, _LANE), data_idx),          # labels
            ],
            out_specs=pl.BlockSpec((32, _LANE), lambda core, t: (core, 0)),
        ),
        compiler_params=pltpu.CompilerParams(
            dimension_semantics=("parallel", "arbitrary")),
        cost_estimate=pl.CostEstimate(
            flops=8 * bp, transcendentals=0, bytes_accessed=bytes_accessed),
    )(c, o2, l2)

    sums = partials.reshape(num_cores, 4, 8, _LANE).sum(axis=(0, 2, 3))
    s_o, s_o2, s_l, s_l2 = sums[0], sums[1], sums[2], sums[3]
    nb = float(B)
    total = nb * s_o2 + nb * s_l2 - 2.0 * s_o * s_l
    return total * (1.0 / (nb * nb))


def _mrl_loss_small(outputs, labels):
    """Pure-jnp closed form (same math) — faster than a kernel launch at small B."""
    o = outputs.astype(jnp.float32).reshape(-1)
    l = labels.astype(jnp.float32).reshape(-1)
    c = l[0]
    oc, lc = o - c, l - c
    nb = float(o.shape[0])
    total = nb * jnp.sum(oc * oc) + nb * jnp.sum(lc * lc) \
        - 2.0 * jnp.sum(oc) * jnp.sum(lc)
    return total * (1.0 / (nb * nb))


def mrl_loss(outputs, labels, *, use_pallas=None):
    """outputs: [B, 1], labels: [B] -> scalar f32 (PyTorch MSELoss broadcast)."""
    B = outputs.shape[0]
    if use_pallas is None:
        use_pallas = B >= _SMALL_B_PALLAS
    if not use_pallas:
        return _mrl_loss_small(outputs, labels)
    return _mrl_loss_pallas(outputs, labels)


if __name__ == "__main__":
    key = jax.random.PRNGKey(0)
    k1, k2, k3, k4 = jax.random.split(key, 4)

    # Case 1: tiny batch, forced through the Pallas kernel. Labels get a large
    # common offset to exercise the centering / cancellation path.
    B1 = 8
    out1 = jax.random.normal(k1, (B1, 1), dtype=jnp.float32)
    lab1 = jax.random.normal(k2, (B1,), dtype=jnp.float32) + 5.0
    loss1 = mrl_loss(out1, lab1, use_pallas=True)
    jax.block_until_ready(loss1)
    ref1 = jnp.mean((out1.astype(jnp.float32)
                     - lab1.astype(jnp.float32)[None, :]) ** 2)
    assert jnp.allclose(loss1, ref1, rtol=1e-5, atol=1e-6), (loss1, ref1)

    # Case 2: multi-tile, two-core-split path with a partial last block
    # (B=2176 -> 17 rows of 128, tile_rows=16), bf16 inputs cast in-kernel.
    B2 = 2176
    out2 = jax.random.normal(k3, (B2, 1), dtype=jnp.bfloat16)
    lab2 = jax.random.normal(k4, (B2,), dtype=jnp.bfloat16)
    loss2 = mrl_loss(out2, lab2, use_pallas=True)
    jax.block_until_ready(loss2)
    ref2 = jnp.mean((out2.astype(jnp.float32)
                     - lab2.astype(jnp.float32)[None, :]) ** 2)
    assert jnp.allclose(loss2, ref2, rtol=1e-4, atol=1e-5), (loss2, ref2)

    # Case 3: small-B pure-jnp fast path agrees too.
    loss3 = mrl_loss(out1, lab1)
    jax.block_until_ready(loss3)
    assert jnp.allclose(loss3, ref1, rtol=1e-5, atol=1e-6), (loss3, ref1)

    print("KERNEL_OK")
</pallas_src>

<mosaic_0001>
module attributes {stable_mosaic.version = 11 : i64} {
  func.func @_mrl_partial_sums_kernel(%arg0: i32, %arg1: i32, %arg2: memref<1xf32, #tpu.memory_space<smem>>, %arg3: memref<16x128xf32, #tpu.memory_space<vmem>>, %arg4: memref<16x128xf32, #tpu.memory_space<vmem>>, %arg5: memref<32x128xf32, #tpu.memory_space<vmem>>) attributes {dimension_semantics = [#tpu.dimension_semantics<parallel>, #tpu.dimension_semantics<arbitrary>], iteration_bounds = array<i64: 1, 1>, scalar_prefetch = 0 : i64, scratch_operands = 0 : i64, tpu.core_type = #tpu.core_type<tc>, window_params = [{transform_indices = @transform_0, window_bounds = array<i64: 1>}, {transform_indices = @transform_1, window_bounds = array<i64: 16, 128>}, {transform_indices = @transform_2, window_bounds = array<i64: 16, 128>}, {transform_indices = @transform_3, window_bounds = array<i64: 32, 128>}]} {
    %c0_i32 = arith.constant 0 : i32
    %0 = arith.cmpi eq, %arg1, %c0_i32 : i32
    %1 = arith.extui %0 : i1 to i32
    %c0_i32_0 = arith.constant 0 : i32
    %2 = arith.cmpi ne, %1, %c0_i32_0 : i32
    scf.if %2 {
      %cst_22 = arith.constant 0.000000e+00 : f32
      %47 = vector.broadcast %cst_22 : f32 to vector<32x128xf32>
      %c0_23 = arith.constant 0 : index
      %c0_24 = arith.constant 0 : index
      %48 = vector.load %arg5[%c0_23, %c0_24] : memref<32x128xf32, #tpu.memory_space<vmem>>, vector<32x128xf32>
      tpu.vector_store %arg5[%c0_23, %c0_24], %47 {strides = array<i32>} : memref<32x128xf32, #tpu.memory_space<vmem>>, vector<32x128xf32>,
    } else {
    }
    %c0 = arith.constant 0 : index
    %3 = memref.load %arg2[%c0] : memref<1xf32, #tpu.memory_space<smem>>
    %c0_1 = arith.constant 0 : index
    %c0_2 = arith.constant 0 : index
    %4 = vector.load %arg3[%c0_1, %c0_2] : memref<16x128xf32, #tpu.memory_space<vmem>>, vector<16x128xf32>
    %5 = vector.broadcast %3 : f32 to vector<16x128xf32>
    %6 = arith.subf %4, %5 : vector<16x128xf32>
    %c0_3 = arith.constant 0 : index
    %c0_4 = arith.constant 0 : index
    %7 = vector.load %arg4[%c0_3, %c0_4] : memref<16x128xf32, #tpu.memory_space<vmem>>, vector<16x128xf32>
    %8 = vector.broadcast %3 : f32 to vector<16x128xf32>
    %9 = arith.subf %7, %8 : vector<16x128xf32>
    %c1_i32 = arith.constant 1 : i32
    %10 = arith.muli %arg0, %c1_i32 : i32
    %11 = arith.addi %10, %arg1 : i32
    %c16_i32 = arith.constant 16 : i32
    %12 = arith.muli %11, %c16_i32 : i32
    %13 = tpu.iota {dimensions = array<i32: 0>} : vector<16x128xi32>
    %14 = tpu.iota {dimensions = array<i32: 1>} : vector<16x128xi32>
    %15 = vector.broadcast %12 : i32 to vector<16x128xi32>
    %16 = arith.addi %15, %13 : vector<16x128xi32>
    %c128_i32 = arith.constant 128 : i32
    %17 = vector.broadcast %c128_i32 : i32 to vector<16x128xi32>
    %18 = arith.muli %16, %17 : vector<16x128xi32>
    %19 = arith.addi %18, %14 : vector<16x128xi32>
    %c8_i32 = arith.constant 8 : i32
    %20 = vector.broadcast %c8_i32 : i32 to vector<16x128xi32>
    %21 = arith.cmpi slt, %19, %20 : vector<16x128xi32>
    %cst = arith.constant 0.000000e+00 : f32
    %22 = vector.broadcast %cst : f32 to vector<16x128xf32>
    %23 = arith.select %21, %6, %22 : vector<16x128xi1>, vector<16x128xf32>
    %24 = arith.select %21, %9, %22 : vector<16x128xi1>, vector<16x128xf32>
    %c0_5 = arith.constant 0 : index
    %c0_6 = arith.constant 0 : index
    %25 = vector.load %arg5[%c0_5, %c0_6] : memref<32x128xf32, #tpu.memory_space<vmem>>, vector<8x128xf32>
    %26 = vector.shape_cast %23 : vector<16x128xf32> to vector<2x8x128xf32>
    %cst_7 = arith.constant dense<0.000000e+00> : vector<8x128xf32>
    %27 = vector.multi_reduction <add>, %26, %cst_7 [0] : vector<2x8x128xf32> to vector<8x128xf32>
    %28 = arith.addf %25, %27 : vector<8x128xf32>
    %c0_8 = arith.constant 0 : index
    %c0_9 = arith.constant 0 : index
    %29 = vector.load %arg5[%c0_8, %c0_9] : memref<32x128xf32, #tpu.memory_space<vmem>>, vector<8x128xf32>
    tpu.vector_store %arg5[%c0_8, %c0_9], %28 {strides = array<i32>} : memref<32x128xf32, #tpu.memory_space<vmem>>, vector<8x128xf32>,
    %c8 = arith.constant 8 : index
    %c0_10 = arith.constant 0 : index
    %30 = vector.load %arg5[%c8, %c0_10] : memref<32x128xf32, #tpu.memory_space<vmem>>, vector<8x128xf32>
    %31 = arith.mulf %23, %23 : vector<16x128xf32>
    %32 = vector.shape_cast %31 : vector<16x128xf32> to vector<2x8x128xf32>
    %cst_11 = arith.constant dense<0.000000e+00> : vector<8x128xf32>
    %33 = vector.multi_reduction <add>, %32, %cst_11 [0] : vector<2x8x128xf32> to vector<8x128xf32>
    %34 = arith.addf %30, %33 : vector<8x128xf32>
    %c8_12 = arith.constant 8 : index
    %c0_13 = arith.constant 0 : index
    %35 = vector.load %arg5[%c8_12, %c0_13] : memref<32x128xf32, #tpu.memory_space<vmem>>, vector<8x128xf32>
    tpu.vector_store %arg5[%c8_12, %c0_13], %34 {strides = array<i32>} : memref<32x128xf32, #tpu.memory_space<vmem>>, vector<8x128xf32>,
    %c16 = arith.constant 16 : index
    %c0_14 = arith.constant 0 : index
    %36 = vector.load %arg5[%c16, %c0_14] : memref<32x128xf32, #tpu.memory_space<vmem>>, vector<8x128xf32>
    %37 = vector.shape_cast %24 : vector<16x128xf32> to vector<2x8x128xf32>
    %cst_15 = arith.constant dense<0.000000e+00> : vector<8x128xf32>
    %38 = vector.multi_reduction <add>, %37, %cst_15 [0] : vector<2x8x128xf32> to vector<8x128xf32>
    %39 = arith.addf %36, %38 : vector<8x128xf32>
    %c16_16 = arith.constant 16 : index
    %c0_17 = arith.constant 0 : index
    %40 = vector.load %arg5[%c16_16, %c0_17] : memref<32x128xf32, #tpu.memory_space<vmem>>, vector<8x128xf32>
    tpu.vector_store %arg5[%c16_16, %c0_17], %39 {strides = array<i32>} : memref<32x128xf32, #tpu.memory_space<vmem>>, vector<8x128xf32>,
    %c24 = arith.constant 24 : index
    %c0_18 = arith.constant 0 : index
    %41 = vector.load %arg5[%c24, %c0_18] : memref<32x128xf32, #tpu.memory_space<vmem>>, vector<8x128xf32>
    %42 = arith.mulf %24, %24 : vector<16x128xf32>
    %43 = vector.shape_cast %42 : vector<16x128xf32> to vector<2x8x128xf32>
    %cst_19 = arith.constant dense<0.000000e+00> : vector<8x128xf32>
    %44 = vector.multi_reduction <add>, %43, %cst_19 [0] : vector<2x8x128xf32> to vector<8x128xf32>
    %45 = arith.addf %41, %44 : vector<8x128xf32>
    %c24_20 = arith.constant 24 : index
    %c0_21 = arith.constant 0 : index
    %46 = vector.load %arg5[%c24_20, %c0_21] : memref<32x128xf32, #tpu.memory_space<vmem>>, vector<8x128xf32>
    tpu.vector_store %arg5[%c24_20, %c0_21], %45 {strides = array<i32>} : memref<32x128xf32, #tpu.memory_space<vmem>>, vector<8x128xf32>,
    return
  }
  func.func @transform_0(%arg0: i32, %arg1: i32) -> i32 {
    %c0_i32 = arith.constant 0 : i32
    %c0_i32_0 = arith.constant 0 : i32
    return %c0_i32 : i32
  }
  func.func @transform_1(%arg0: i32, %arg1: i32) -> (i32, i32) {
    %c1_i32 = arith.constant 1 : i32
    %0 = arith.muli %arg0, %c1_i32 : i32
    %1 = arith.addi %0, %arg1 : i32
    %c0_i32 = arith.constant 0 : i32
    %2 = arith.minsi %1, %c0_i32 : i32
    %c0_i32_0 = arith.constant 0 : i32
    %c0_i32_1 = arith.constant 0 : i32
    return %2, %c0_i32_0 : i32, i32
  }
  func.func @transform_2(%arg0: i32, %arg1: i32) -> (i32, i32) {
    %c1_i32 = arith.constant 1 : i32
    %0 = arith.muli %arg0, %c1_i32 : i32
    %1 = arith.addi %0, %arg1 : i32
    %c0_i32 = arith.constant 0 : i32
    %2 = arith.minsi %1, %c0_i32 : i32
    %c0_i32_0 = arith.constant 0 : i32
    %c0_i32_1 = arith.constant 0 : i32
    return %2, %c0_i32_0 : i32, i32
  }
  func.func @transform_3(%arg0: i32, %arg1: i32) -> (i32, i32) {
    %c0_i32 = arith.constant 0 : i32
    %c0_i32_0 = arith.constant 0 : i32
    return %arg0, %c0_i32 : i32, i32
  }
}

</mosaic_0001>

<bundles_post_ra>
// kernel: tpu_custom_call.1
= control target key start
LH: loop header
LB: loop body
LE: loop exit
PB: predicated region body
PF: predicated region fallthrough
CT: control target
= control target key end

     0   :  { %9 = vsyncpa [#allocation4], 0  ;;  %s295_s0 = inlined_call_operand.<no memory space> [shape: f32[1], index: 0, kind: input, shape index: {}]   ;;  %s296_s1 = inlined_call_operand.hbm [shape: f32[16,128], index: 1, kind: input, shape index: {}]   ;;  %s297_s2 = inlined_call_operand.hbm [shape: f32[16,128], index: 2, kind: input, shape index: {}]   ;;  %s298_s3 = inlined_call_operand.hbm [shape: f32[32,128], index: 3, kind: output, shape index: {}]  }
   0x1   :  { %10 = vsyncpa [#allocation7], 0 }
   0x2   :  { %11 = vsyncpa [#allocation5], 0  ;;  %s222_s12 = smov [#allocation3]   ;;  %s150_s16 = scalar_lea.hbm %s296_s1, 256 }
   0x3   :  { %s25_s13 = sshll.u32 %s222_s12, 4  ;;  %p151_p0 = scmp.ne.s32.totalorder %s296_s1, %s150_s16  ;;  %s26_s13 = int_to_ptr.vmem [resolvable:$true] %s25_s13 }
   0x4   :  { %p154_p1 = scmp.lt.u32.totalorder %s150_s16, %s296_s1 }
   0x6   :  { %p156_p2 = pnand %p154_p1, %p151_p0 }
   0x8   :  { %159 = shalt.err (!%p156_p2)
}
   0x9   :  { %s160_s21 = scalar_lea.vmem %s26_s13, 256  ;;  %p165_p4 = scmp.lt.s32.totalorder %s26_s13, %s26_s13 }
   0xa   :  { %p161_p3 = scmp.ne.s32.totalorder %s26_s13, %s160_s21  ;;  %p166_p5 = scmp.lt.s32.totalorder %s160_s21, %s160_s21 }
   0xc   :  { %p167_p6 = por %p166_p5, %p165_p4 }
   0xe   :  { %p168_p7 = pnand %p167_p6, %p161_p3 }
  0x10   :  { %171 = shalt.err (!%p168_p7)
}
  0x11   :  { %s223_s22 = smov 128   ;;  %s224_s23 = smov 8  }
  0x12   :  { %31 = dma.hbm_to_vmem [thread:$0]  %s296_s1, 256, %s26_s13, [#allocation4], %s223_s22, %s223_s22, %s224_s23  }
  0x13   :  { %s225_s26 = smov [#allocation6]   ;;  %s172_s30 = scalar_lea.hbm %s297_s2, 256 }
  0x14   :  { %s43_s27 = sshll.u32 %s225_s26, 4  ;;  %p173_p8 = scmp.ne.s32.totalorder %s297_s2, %s172_s30  ;;  %s44_s27 = int_to_ptr.vmem [resolvable:$true] %s43_s27 }
  0x15   :  { %p176_p9 = scmp.lt.u32.totalorder %s172_s30, %s297_s2 }
  0x17   :  { %p178_p10 = pnand %p176_p9, %p173_p8 }
  0x19   :  { %181 = shalt.err (!%p178_p10)
}
  0x1a   :  { %s182_s8 = scalar_lea.vmem %s44_s27, 256  ;;  %p187_p12 = scmp.lt.s32.totalorder %s44_s27, %s44_s27 }
  0x1b   :  { %p183_p11 = scmp.ne.s32.totalorder %s44_s27, %s182_s8  ;;  %p188_p13 = scmp.lt.s32.totalorder %s182_s8, %s182_s8 }
  0x1d   :  { %p189_p0 = por %p188_p13, %p187_p12 }
  0x1f   :  { %p190_p1 = pnand %p189_p0, %p183_p11 }
  0x21   :  { %193 = shalt.err (!%p190_p1)
}
  0x22   :  { %49 = dma.hbm_to_vmem [thread:$0]  %s297_s2, 256, %s44_s27, [#allocation7], %s223_s22, %s223_s22, %s224_s23  }
  0x23   :  { %216 = dma.done.wait [#allocation4], 256  }
  0x24   :  { %217 = vsyncadd [#allocation4], 4294967040 }
  0x25   :  { %218 = dma.done.wait [#allocation7], 256  }
  0x26   :  { %219 = vsyncadd [#allocation7], 4294967040  ;;  %v84_v0 = vlaneseq  ;;  %v75_v5 = vstv %s295_s0  ;;  %v73_v8 = vld [vmem:[#allocation3] sm:$0xff]  ;;  %v74_v9 = vld [vmem:[#allocation3 + $0x8] sm:$0xff]  ;;  %s226_s0 = smov [#allocation8]  }
  0x27   :  { %v78_v10 = vld [vmem:[#allocation6] sm:$0xff]  ;;  %v76_v11 = vsub.f32 %v73_v8, %v75_v5  ;;  %v77_v12 = vsub.f32 %v74_v9, %v75_v5  ;;  %v79_v14 = vld [vmem:[#allocation6 + $0x8] sm:$0xff]  ;;  %s127_s2 = sshll.u32 %s226_s0, 4  ;;  %s128_s2 = int_to_ptr.vmem [resolvable:$true] %s127_s2 }
  0x28   :  { %v85_v1 = vshrl.u32 %v84_v0, 7  ;;  %v88_v2 = vand.u32 127, %v84_v0  ;;  %v80_v15 = vsub.f32 %v78_v10, %v75_v5  ;;  %v81_v16 = vsub.f32 %v79_v14, %v75_v5  ;;  %s194_s12 = scalar_lea.vmem %s128_s2, 512  ;;  %p199_p3 = scmp.lt.s32.totalorder %s128_s2, %s128_s2 }
  0x29   :  { %p195_p2 = scmp.ne.s32.totalorder %s128_s2, %s194_s12  ;;  %p200_p4 = scmp.lt.s32.totalorder %s194_s12, %s194_s12 }
  0x2a   :  { %v86_v3 = vadd.s32 8, %v85_v1  ;;  %v92_v4 = vmul.u32 128, %v85_v1 }
  0x2b   :  { %p201_p5 = por %p200_p4, %p199_p3 }
  0x2c   :  { %v93_v6 = vmul.u32 128, %v86_v3  ;;  %v94_v7 = vadd.s32 %v92_v4, %v88_v2 }
  0x2d   :  { %p202_p6 = pnand %p201_p5, %p195_p2 }
  0x2e   :  { %v95_v13 = vadd.s32 %v93_v6, %v88_v2  ;;  %vm96_vm0 = vcmp.lt.s32.totalorder %v94_v7, 8 }
  0x2f   :  { %v98_v17 = vsel %vm96_vm0, %v76_v11, 0.0  ;;  %v100_v20 = vsel %vm96_vm0, %v80_v15, 0.0 }
  0x30   :  { %vm97_vm1 = vcmp.lt.s32.totalorder %v95_v13, 8  ;;  %v107_v19 = vmul.f32 %v98_v17, %v98_v17  ;;  %v117_v25 = vmul.f32 %v100_v20, %v100_v20 }
  0x31   :  { %v99_v18 = vsel %vm97_vm1, %v77_v12, 0.0  ;;  %v101_v21 = vsel %vm97_vm1, %v81_v16, 0.0 }
  0x32   :  { %v103_v22 = vadd.f32 %v99_v18, %v98_v17  ;;  %v108_v23 = vmul.f32 %v99_v18, %v99_v18  ;;  %v113_v24 = vadd.f32 %v101_v21, %v100_v20  ;;  %v118_v26 = vmul.f32 %v101_v21, %v101_v21 }
  0x34   :  { %v109_v27 = vadd.f32 %v108_v23, %v107_v19  ;;  %v119_v28 = vadd.f32 %v118_v26, %v117_v25  ;;  %105 = vst [vmem:[#allocation8] sm:$0xff] %v103_v22  ;;  %115 = vst [vmem:[#allocation8 + $0x10] sm:$0xff] %v113_v24 }
  0x36   :  { %111 = vst [vmem:[#allocation8 + $0x8] sm:$0xff] %v109_v27  ;;  %121 = vst [vmem:[#allocation8 + $0x18] sm:$0xff] %v119_v28 }
  0x37   :  { %205 = shalt.err (!%p202_p6)
}
  0x38   :  { %s206_s15 = scalar_lea.hbm %s298_s3, 512 }
  0x39   :  { %p207_p7 = scmp.ne.s32.totalorder %s298_s3, %s206_s15  ;;  %p210_p8 = scmp.lt.u32.totalorder %s206_s15, %s298_s3 }
  0x3b   :  { %p212_p9 = pnand %p210_p8, %p207_p7 }
  0x3d   :  { %215 = shalt.err (!%p212_p9)
}
  0x3e   :  { %133 = dma.vmem_to_hbm [thread:$0]  %s128_s2, 512, %s298_s3, [#allocation5], %s223_s22, %s223_s22, %s224_s23  }
  0x3f   :  { %220 = dma.done.wait [#allocation5], 512  }
  0x40   :  { %221 = vsyncadd [#allocation5], 4294966784 }
  0x41   :  { %137 = vsyncpa [#allocation4], 1 }
  0x42   :  { %138 = vsyncpa [#allocation7], 1 }
  0x43   :  { %139 = vsyncpa [#allocation5], 1 }

</bundles_post_ra>
